<compile_context>
chip_gen: v7x
topology: tpu7x:2x2x1
jax: 0.10.0
libtpu: 0.0.40
codegen_flags: <defaults>
</compile_context>

<pallas_src>
import functools

import jax
import jax.numpy as jnp
from jax import lax
from jax.experimental import pallas as pl
from jax.experimental.pallas import tpu as pltpu


def _mha_fused_kernel(x_ref, wq_ref, wk_ref, wv_ref, wp_ref, bp_ref,
                      o_ref, y_ref, *, n_heads, head_size):
    # x_ref:   (1, T, C)    one batch element
    # wq/wk/wv_ref: (C, C)  all heads stacked column-wise; wq pre-scaled
    # wp_ref:  (C, C)       output projection weight (x @ W convention)
    # bp_ref:  (1, C)       output projection bias
    # o_ref:   (1, T, C)    result
    # y_ref:   (T, C)       VMEM scratch: concatenated head outputs
    x = x_ref[0]                                                    # (T, C)

    # Fused QKV projections for all heads: (T, C) @ (C, C) — wide MXU feed.
    q = jnp.dot(x, wq_ref[...], preferred_element_type=jnp.float32)  # scale folded in
    k = jnp.dot(x, wk_ref[...], preferred_element_type=jnp.float32)
    v = jnp.dot(x, wv_ref[...], preferred_element_type=jnp.float32)

    T = x.shape[0]
    row = lax.broadcasted_iota(jnp.int32, (T, T), 0)
    col = lax.broadcasted_iota(jnp.int32, (T, T), 1)
    causal = row >= col
    neg_big = jnp.float32(-1e30)  # finite "masked" value; exp() underflows to 0

    # Per-head attention on column slices; H is small & static -> unrolled.
    for h in range(n_heads):
        sl = slice(h * head_size, (h + 1) * head_size)
        qh = q[:, sl]                                               # (T, hs)
        kh = k[:, sl]                                               # (T, hs)
        vh = v[:, sl]                                               # (T, hs)

        # scores = qh @ kh^T without materializing the transpose.
        scores = lax.dot_general(qh, kh, (((1,), (1,)), ((), ())),
                                 preferred_element_type=jnp.float32)  # (T, T)
        scores = jnp.where(causal, scores, neg_big)

        # softmax (kept exact — division instead of approx reciprocal — so the
        # kernel matches the reference at tight tolerance).
        m = jnp.max(scores, axis=-1, keepdims=True)
        p = jnp.exp(scores - m)
        wei = p / jnp.sum(p, axis=-1, keepdims=True)

        # TODO(synk): dropout on attention weights is identity (inference mode).
        y_ref[:, sl] = jnp.dot(wei, vh, preferred_element_type=jnp.float32)

    # Fused output projection on the lane-dense (T, C) slab.
    out = jnp.dot(y_ref[...], wp_ref[...],
                  preferred_element_type=jnp.float32) + bp_ref[...]
    # TODO(synk): final dropout is identity (inference mode).
    o_ref[0] = out.astype(o_ref.dtype)


def multi_head_attention(x, wq, wk, wv, w_proj, b_proj):
    """x: [B, T, C]; wq/wk/wv: [H, C, hs]; w_proj: [C, C]; b_proj: [C]."""
    B, T, C = x.shape
    H, _, hs = wq.shape
    assert H * hs == C, "n_heads * head_size must equal n_embeds"
    # NOTE: scale uses C = n_embeds (not head_size), mirroring the PyTorch source.
    scale = float(C) ** -0.5

    # Stack per-head weights into [C, H*hs]: column block h == head h's weight.
    def stack(w):
        return jnp.transpose(w, (1, 0, 2)).reshape(C, H * hs)

    wq_cat = stack(wq) * scale          # fold softmax scale into query weights
    wk_cat = stack(wk)
    wv_cat = stack(wv)

    kernel = functools.partial(_mha_fused_kernel, n_heads=H, head_size=hs)

    return pl.pallas_call(
        kernel,
        out_shape=jax.ShapeDtypeStruct((B, T, C), x.dtype),
        grid_spec=pltpu.PrefetchScalarGridSpec(
            num_scalar_prefetch=0,
            grid=(B,),                                   # batch leading, parallel
            in_specs=[
                pl.BlockSpec((1, T, C), lambda b: (b, 0, 0)),   # x
                pl.BlockSpec((C, C), lambda b: (0, 0)),          # wq (scaled)
                pl.BlockSpec((C, C), lambda b: (0, 0)),          # wk
                pl.BlockSpec((C, C), lambda b: (0, 0)),          # wv
                pl.BlockSpec((C, C), lambda b: (0, 0)),          # w_proj
                pl.BlockSpec((1, C), lambda b: (0, 0)),          # b_proj
            ],
            out_specs=pl.BlockSpec((1, T, C), lambda b: (b, 0, 0)),
            scratch_shapes=[pltpu.VMEM((T, C), jnp.float32)],    # concat buffer
        ),
        compiler_params=pltpu.CompilerParams(
            dimension_semantics=("parallel",)),
    )(x, wq_cat, wk_cat, wv_cat, w_proj, b_proj.reshape(1, C))


def _reference(x, wq, wk, wv, w_proj, b_proj):
    """Pure-JAX reference mirroring the PyTorch forward (eval mode)."""
    B, T, C = x.shape
    H, _, hs = wq.shape
    scale = float(C) ** -0.5
    q = jnp.einsum("btc,hcd->bhtd", x, wq)
    k = jnp.einsum("btc,hcd->bhtd", x, wk)
    v = jnp.einsum("btc,hcd->bhtd", x, wv)
    wei = jnp.einsum("bhtd,bhsd->bhts", q, k) * scale
    tril = jnp.tril(jnp.ones((T, T), dtype=bool))
    wei = jnp.where(tril, wei, -jnp.inf)
    wei = jax.nn.softmax(wei, axis=-1)
    out = jnp.einsum("bhts,bhsd->bhtd", wei, v)
    out = jnp.transpose(out, (0, 2, 1, 3)).reshape(B, T, C)
    return out @ w_proj + b_proj


if __name__ == "__main__":
    # small shapes: n_heads=4, n_embeds=32, head_size=8, block_size(T)=8, B=2
    B, T = 2, 8
    n_heads, n_embeds, head_size = 4, 32, 8

    key = jax.random.PRNGKey(0)
    kx, kq, kk, kv, kp, kb = jax.random.split(key, 6)

    x = jax.random.normal(kx, (B, T, n_embeds), dtype=jnp.float32)
    # per-head weights stacked [H, C, hs] (x @ W convention)
    wq = jax.random.normal(kq, (n_heads, n_embeds, head_size), jnp.float32) * 0.1
    wk = jax.random.normal(kk, (n_heads, n_embeds, head_size), jnp.float32) * 0.1
    wv = jax.random.normal(kv, (n_heads, n_embeds, head_size), jnp.float32) * 0.1
    w_proj = jax.random.normal(kp, (n_embeds, n_embeds), jnp.float32) * 0.1
    b_proj = jax.random.normal(kb, (n_embeds,), jnp.float32) * 0.1

    out = multi_head_attention(x, wq, wk, wv, w_proj, b_proj)
    out = jax.block_until_ready(out)

    ref = _reference(x, wq, wk, wv, w_proj, b_proj)
    assert out.shape == (B, T, n_embeds)
    assert jnp.allclose(out, ref, atol=1e-5, rtol=1e-5), "mismatch vs reference"

    print("KERNEL_OK")
</pallas_src>

<mosaic_0001>
module attributes {stable_mosaic.version = 11 : i64} {
  func.func @_mha_fused_kernel(%arg0: i32, %arg1: memref<1x8x32xf32, #tpu.memory_space<vmem>>, %arg2: memref<32x32xf32, #tpu.memory_space<vmem>>, %arg3: memref<32x32xf32, #tpu.memory_space<vmem>>, %arg4: memref<32x32xf32, #tpu.memory_space<vmem>>, %arg5: memref<32x32xf32, #tpu.memory_space<vmem>>, %arg6: memref<1x32xf32, #tpu.memory_space<vmem>>, %arg7: memref<1x8x32xf32, #tpu.memory_space<vmem>>, %arg8: memref<8x32xf32, #tpu.memory_space<vmem>>) attributes {dimension_semantics = [#tpu.dimension_semantics<parallel>], iteration_bounds = array<i64: 2>, scalar_prefetch = 0 : i64, scratch_operands = 1 : i64, tpu.core_type = #tpu.core_type<tc>, window_params = [{transform_indices = @transform_0, window_bounds = array<i64: 1, 8, 32>}, {pipeline_mode = #tpu.pipeline_mode<synchronous>, transform_indices = @transform_1, window_bounds = array<i64: 32, 32>}, {pipeline_mode = #tpu.pipeline_mode<synchronous>, transform_indices = @transform_2, window_bounds = array<i64: 32, 32>}, {pipeline_mode = #tpu.pipeline_mode<synchronous>, transform_indices = @transform_3, window_bounds = array<i64: 32, 32>}, {pipeline_mode = #tpu.pipeline_mode<synchronous>, transform_indices = @transform_4, window_bounds = array<i64: 32, 32>}, {pipeline_mode = #tpu.pipeline_mode<synchronous>, transform_indices = @transform_5, window_bounds = array<i64: 1, 32>}, {transform_indices = @transform_6, window_bounds = array<i64: 1, 8, 32>}]} {
    %c0 = arith.constant 0 : index
    %c0_0 = arith.constant 0 : index
    %c0_1 = arith.constant 0 : index
    %0 = vector.load %arg1[%c0, %c0_0, %c0_1] : memref<1x8x32xf32, #tpu.memory_space<vmem>>, vector<1x8x32xf32>
    %1 = vector.shape_cast %0 : vector<1x8x32xf32> to vector<8x32xf32>
    %c0_2 = arith.constant 0 : index
    %c0_3 = arith.constant 0 : index
    %2 = vector.load %arg2[%c0_2, %c0_3] : memref<32x32xf32, #tpu.memory_space<vmem>>, vector<32x32xf32>
    %cst = arith.constant dense<0.000000e+00> : vector<8x32xf32>
    %3 = tpu.matmul %1, %2, %cst {dimension_numbers = #tpu.dot_dimension_numbers<[1], [0], [0], [1], [0, 0, 1, 1], [], []>} : vector<8x32xf32>, vector<32x32xf32>, vector<8x32xf32> -> vector<8x32xf32>
    %c0_4 = arith.constant 0 : index
    %c0_5 = arith.constant 0 : index
    %4 = vector.load %arg3[%c0_4, %c0_5] : memref<32x32xf32, #tpu.memory_space<vmem>>, vector<32x32xf32>
    %cst_6 = arith.constant dense<0.000000e+00> : vector<8x32xf32>
    %5 = tpu.matmul %1, %4, %cst_6 {dimension_numbers = #tpu.dot_dimension_numbers<[1], [0], [0], [1], [0, 0, 1, 1], [], []>} : vector<8x32xf32>, vector<32x32xf32>, vector<8x32xf32> -> vector<8x32xf32>
    %c0_7 = arith.constant 0 : index
    %c0_8 = arith.constant 0 : index
    %6 = vector.load %arg4[%c0_7, %c0_8] : memref<32x32xf32, #tpu.memory_space<vmem>>, vector<32x32xf32>
    %cst_9 = arith.constant dense<0.000000e+00> : vector<8x32xf32>
    %7 = tpu.matmul %1, %6, %cst_9 {dimension_numbers = #tpu.dot_dimension_numbers<[1], [0], [0], [1], [0, 0, 1, 1], [], []>} : vector<8x32xf32>, vector<32x32xf32>, vector<8x32xf32> -> vector<8x32xf32>
    %8 = tpu.iota {dimensions = array<i32: 0>} : vector<8x8xi32>
    %9 = tpu.iota {dimensions = array<i32: 1>} : vector<8x8xi32>
    %10 = arith.cmpi sge, %8, %9 : vector<8x8xi32>
    %11 = vector.extract_strided_slice %3 {offsets = [0, 0], sizes = [8, 8], strides = [1, 1]} : vector<8x32xf32> to vector<8x8xf32>
    %12 = vector.extract_strided_slice %5 {offsets = [0, 0], sizes = [8, 8], strides = [1, 1]} : vector<8x32xf32> to vector<8x8xf32>
    %13 = vector.extract_strided_slice %7 {offsets = [0, 0], sizes = [8, 8], strides = [1, 1]} : vector<8x32xf32> to vector<8x8xf32>
    %cst_10 = arith.constant dense<0.000000e+00> : vector<8x8xf32>
    %14 = tpu.matmul %11, %12, %cst_10 {dimension_numbers = #tpu.dot_dimension_numbers<[1], [1], [0], [0], [0, 0, 1, 0], [], []>} : vector<8x8xf32>, vector<8x8xf32>, vector<8x8xf32> -> vector<8x8xf32>
    %cst_11 = arith.constant -1.000000e+30 : f32
    %15 = vector.broadcast %cst_11 : f32 to vector<8x8xf32>
    %16 = arith.select %10, %14, %15 : vector<8x8xi1>, vector<8x8xf32>
    %cst_12 = arith.constant dense<0xFF800000> : vector<8xf32>
    %17 = vector.multi_reduction <maximumf>, %16, %cst_12 [1] : vector<8x8xf32> to vector<8xf32>
    %18 = vector.shape_cast %17 : vector<8xf32> to vector<8x1xf32>
    %19 = vector.broadcast %18 : vector<8x1xf32> to vector<8x8xf32>
    %20 = arith.subf %16, %19 : vector<8x8xf32>
    %21 = math.exp %20 : vector<8x8xf32>
    %cst_13 = arith.constant dense<0.000000e+00> : vector<8xf32>
    %22 = vector.multi_reduction <add>, %21, %cst_13 [1] : vector<8x8xf32> to vector<8xf32>
    %23 = vector.shape_cast %22 : vector<8xf32> to vector<8x1xf32>
    %24 = vector.broadcast %23 : vector<8x1xf32> to vector<8x8xf32>
    %25 = arith.divf %21, %24 : vector<8x8xf32>
    %cst_14 = arith.constant dense<0.000000e+00> : vector<8x8xf32>
    %26 = tpu.matmul %25, %13, %cst_14 {dimension_numbers = #tpu.dot_dimension_numbers<[1], [0], [0], [1], [0, 0, 1, 1], [], []>} : vector<8x8xf32>, vector<8x8xf32>, vector<8x8xf32> -> vector<8x8xf32>
    %c0_15 = arith.constant 0 : index
    %c0_16 = arith.constant 0 : index
    %27 = vector.load %arg8[%c0_15, %c0_16] : memref<8x32xf32, #tpu.memory_space<vmem>>, vector<8x8xf32>
    tpu.vector_store %arg8[%c0_15, %c0_16], %26 {strides = array<i32>} : memref<8x32xf32, #tpu.memory_space<vmem>>, vector<8x8xf32>,
    %28 = vector.extract_strided_slice %3 {offsets = [0, 8], sizes = [8, 8], strides = [1, 1]} : vector<8x32xf32> to vector<8x8xf32>
    %29 = vector.extract_strided_slice %5 {offsets = [0, 8], sizes = [8, 8], strides = [1, 1]} : vector<8x32xf32> to vector<8x8xf32>
    %30 = vector.extract_strided_slice %7 {offsets = [0, 8], sizes = [8, 8], strides = [1, 1]} : vector<8x32xf32> to vector<8x8xf32>
    %cst_17 = arith.constant dense<0.000000e+00> : vector<8x8xf32>
    %31 = tpu.matmul %28, %29, %cst_17 {dimension_numbers = #tpu.dot_dimension_numbers<[1], [1], [0], [0], [0, 0, 1, 0], [], []>} : vector<8x8xf32>, vector<8x8xf32>, vector<8x8xf32> -> vector<8x8xf32>
    %cst_18 = arith.constant -1.000000e+30 : f32
    %32 = vector.broadcast %cst_18 : f32 to vector<8x8xf32>
    %33 = arith.select %10, %31, %32 : vector<8x8xi1>, vector<8x8xf32>
    %cst_19 = arith.constant dense<0xFF800000> : vector<8xf32>
    %34 = vector.multi_reduction <maximumf>, %33, %cst_19 [1] : vector<8x8xf32> to vector<8xf32>
    %35 = vector.shape_cast %34 : vector<8xf32> to vector<8x1xf32>
    %36 = vector.broadcast %35 : vector<8x1xf32> to vector<8x8xf32>
    %37 = arith.subf %33, %36 : vector<8x8xf32>
    %38 = math.exp %37 : vector<8x8xf32>
    %cst_20 = arith.constant dense<0.000000e+00> : vector<8xf32>
    %39 = vector.multi_reduction <add>, %38, %cst_20 [1] : vector<8x8xf32> to vector<8xf32>
    %40 = vector.shape_cast %39 : vector<8xf32> to vector<8x1xf32>
    %41 = vector.broadcast %40 : vector<8x1xf32> to vector<8x8xf32>
    %42 = arith.divf %38, %41 : vector<8x8xf32>
    %cst_21 = arith.constant dense<0.000000e+00> : vector<8x8xf32>
    %43 = tpu.matmul %42, %30, %cst_21 {dimension_numbers = #tpu.dot_dimension_numbers<[1], [0], [0], [1], [0, 0, 1, 1], [], []>} : vector<8x8xf32>, vector<8x8xf32>, vector<8x8xf32> -> vector<8x8xf32>
    %c0_22 = arith.constant 0 : index
    %c8 = arith.constant 8 : index
    %44 = vector.load %arg8[%c0_22, %c8] : memref<8x32xf32, #tpu.memory_space<vmem>>, vector<8x8xf32>
    tpu.vector_store %arg8[%c0_22, %c8], %43 {strides = array<i32>} : memref<8x32xf32, #tpu.memory_space<vmem>>, vector<8x8xf32>,
    %45 = vector.extract_strided_slice %3 {offsets = [0, 16], sizes = [8, 8], strides = [1, 1]} : vector<8x32xf32> to vector<8x8xf32>
    %46 = vector.extract_strided_slice %5 {offsets = [0, 16], sizes = [8, 8], strides = [1, 1]} : vector<8x32xf32> to vector<8x8xf32>
    %47 = vector.extract_strided_slice %7 {offsets = [0, 16], sizes = [8, 8], strides = [1, 1]} : vector<8x32xf32> to vector<8x8xf32>
    %cst_23 = arith.constant dense<0.000000e+00> : vector<8x8xf32>
    %48 = tpu.matmul %45, %46, %cst_23 {dimension_numbers = #tpu.dot_dimension_numbers<[1], [1], [0], [0], [0, 0, 1, 0], [], []>} : vector<8x8xf32>, vector<8x8xf32>, vector<8x8xf32> -> vector<8x8xf32>
    %cst_24 = arith.constant -1.000000e+30 : f32
    %49 = vector.broadcast %cst_24 : f32 to vector<8x8xf32>
    %50 = arith.select %10, %48, %49 : vector<8x8xi1>, vector<8x8xf32>
    %cst_25 = arith.constant dense<0xFF800000> : vector<8xf32>
    %51 = vector.multi_reduction <maximumf>, %50, %cst_25 [1] : vector<8x8xf32> to vector<8xf32>
    %52 = vector.shape_cast %51 : vector<8xf32> to vector<8x1xf32>
    %53 = vector.broadcast %52 : vector<8x1xf32> to vector<8x8xf32>
    %54 = arith.subf %50, %53 : vector<8x8xf32>
    %55 = math.exp %54 : vector<8x8xf32>
    %cst_26 = arith.constant dense<0.000000e+00> : vector<8xf32>
    %56 = vector.multi_reduction <add>, %55, %cst_26 [1] : vector<8x8xf32> to vector<8xf32>
    %57 = vector.shape_cast %56 : vector<8xf32> to vector<8x1xf32>
    %58 = vector.broadcast %57 : vector<8x1xf32> to vector<8x8xf32>
    %59 = arith.divf %55, %58 : vector<8x8xf32>
    %cst_27 = arith.constant dense<0.000000e+00> : vector<8x8xf32>
    %60 = tpu.matmul %59, %47, %cst_27 {dimension_numbers = #tpu.dot_dimension_numbers<[1], [0], [0], [1], [0, 0, 1, 1], [], []>} : vector<8x8xf32>, vector<8x8xf32>, vector<8x8xf32> -> vector<8x8xf32>
    %c0_28 = arith.constant 0 : index
    %c16 = arith.constant 16 : index
    %61 = vector.load %arg8[%c0_28, %c16] : memref<8x32xf32, #tpu.memory_space<vmem>>, vector<8x8xf32>
    tpu.vector_store %arg8[%c0_28, %c16], %60 {strides = array<i32>} : memref<8x32xf32, #tpu.memory_space<vmem>>, vector<8x8xf32>,
    %62 = vector.extract_strided_slice %3 {offsets = [0, 24], sizes = [8, 8], strides = [1, 1]} : vector<8x32xf32> to vector<8x8xf32>
    %63 = vector.extract_strided_slice %5 {offsets = [0, 24], sizes = [8, 8], strides = [1, 1]} : vector<8x32xf32> to vector<8x8xf32>
    %64 = vector.extract_strided_slice %7 {offsets = [0, 24], sizes = [8, 8], strides = [1, 1]} : vector<8x32xf32> to vector<8x8xf32>
    %cst_29 = arith.constant dense<0.000000e+00> : vector<8x8xf32>
    %65 = tpu.matmul %62, %63, %cst_29 {dimension_numbers = #tpu.dot_dimension_numbers<[1], [1], [0], [0], [0, 0, 1, 0], [], []>} : vector<8x8xf32>, vector<8x8xf32>, vector<8x8xf32> -> vector<8x8xf32>
    %cst_30 = arith.constant -1.000000e+30 : f32
    %66 = vector.broadcast %cst_30 : f32 to vector<8x8xf32>
    %67 = arith.select %10, %65, %66 : vector<8x8xi1>, vector<8x8xf32>
    %cst_31 = arith.constant dense<0xFF800000> : vector<8xf32>
    %68 = vector.multi_reduction <maximumf>, %67, %cst_31 [1] : vector<8x8xf32> to vector<8xf32>
    %69 = vector.shape_cast %68 : vector<8xf32> to vector<8x1xf32>
    %70 = vector.broadcast %69 : vector<8x1xf32> to vector<8x8xf32>
    %71 = arith.subf %67, %70 : vector<8x8xf32>
    %72 = math.exp %71 : vector<8x8xf32>
    %cst_32 = arith.constant dense<0.000000e+00> : vector<8xf32>
    %73 = vector.multi_reduction <add>, %72, %cst_32 [1] : vector<8x8xf32> to vector<8xf32>
    %74 = vector.shape_cast %73 : vector<8xf32> to vector<8x1xf32>
    %75 = vector.broadcast %74 : vector<8x1xf32> to vector<8x8xf32>
    %76 = arith.divf %72, %75 : vector<8x8xf32>
    %cst_33 = arith.constant dense<0.000000e+00> : vector<8x8xf32>
    %77 = tpu.matmul %76, %64, %cst_33 {dimension_numbers = #tpu.dot_dimension_numbers<[1], [0], [0], [1], [0, 0, 1, 1], [], []>} : vector<8x8xf32>, vector<8x8xf32>, vector<8x8xf32> -> vector<8x8xf32>
    %c0_34 = arith.constant 0 : index
    %c24 = arith.constant 24 : index
    %78 = vector.load %arg8[%c0_34, %c24] : memref<8x32xf32, #tpu.memory_space<vmem>>, vector<8x8xf32>
    tpu.vector_store %arg8[%c0_34, %c24], %77 {strides = array<i32>} : memref<8x32xf32, #tpu.memory_space<vmem>>, vector<8x8xf32>,
    %c0_35 = arith.constant 0 : index
    %c0_36 = arith.constant 0 : index
    %79 = vector.load %arg8[%c0_35, %c0_36] : memref<8x32xf32, #tpu.memory_space<vmem>>, vector<8x32xf32>
    %c0_37 = arith.constant 0 : index
    %c0_38 = arith.constant 0 : index
    %80 = vector.load %arg5[%c0_37, %c0_38] : memref<32x32xf32, #tpu.memory_space<vmem>>, vector<32x32xf32>
    %cst_39 = arith.constant dense<0.000000e+00> : vector<8x32xf32>
    %81 = tpu.matmul %79, %80, %cst_39 {dimension_numbers = #tpu.dot_dimension_numbers<[1], [0], [0], [1], [0, 0, 1, 1], [], []>} : vector<8x32xf32>, vector<32x32xf32>, vector<8x32xf32> -> vector<8x32xf32>
    %c0_40 = arith.constant 0 : index
    %c0_41 = arith.constant 0 : index
    %82 = vector.load %arg6[%c0_40, %c0_41] : memref<1x32xf32, #tpu.memory_space<vmem>>, vector<1x32xf32>
    %83 = vector.broadcast %82 : vector<1x32xf32> to vector<8x32xf32>
    %84 = arith.addf %81, %83 : vector<8x32xf32>
    %c0_42 = arith.constant 0 : index
    %c0_43 = arith.constant 0 : index
    %c0_44 = arith.constant 0 : index
    %85 = vector.load %arg7[%c0_42, %c0_43, %c0_44] : memref<1x8x32xf32, #tpu.memory_space<vmem>>, vector<1x8x32xf32>
    %86 = vector.shape_cast %85 : vector<1x8x32xf32> to vector<8x32xf32>
    %87 = vector.shape_cast %84 : vector<8x32xf32> to vector<1x8x32xf32>
    tpu.vector_store %arg7[%c0_42, %c0_43, %c0_44], %87 {strides = array<i32>} : memref<1x8x32xf32, #tpu.memory_space<vmem>>, vector<1x8x32xf32>,
    return
  }
  func.func @transform_0(%arg0: i32) -> (i32, i32, i32) {
    %c0_i32 = arith.constant 0 : i32
    %c0_i32_0 = arith.constant 0 : i32
    %c0_i32_1 = arith.constant 0 : i32
    return %arg0, %c0_i32, %c0_i32_0 : i32, i32, i32
  }
  func.func @transform_1(%arg0: i32) -> (i32, i32) {
    %c0_i32 = arith.constant 0 : i32
    %c0_i32_0 = arith.constant 0 : i32
    %c0_i32_1 = arith.constant 0 : i32
    return %c0_i32, %c0_i32_0 : i32, i32
  }
  func.func @transform_2(%arg0: i32) -> (i32, i32) {
    %c0_i32 = arith.constant 0 : i32
    %c0_i32_0 = arith.constant 0 : i32
    %c0_i32_1 = arith.constant 0 : i32
    return %c0_i32, %c0_i32_0 : i32, i32
  }
  func.func @transform_3(%arg0: i32) -> (i32, i32) {
    %c0_i32 = arith.constant 0 : i32
    %c0_i32_0 = arith.constant 0 : i32
    %c0_i32_1 = arith.constant 0 : i32
    return %c0_i32, %c0_i32_0 : i32, i32
  }
  func.func @transform_4(%arg0: i32) -> (i32, i32) {
    %c0_i32 = arith.constant 0 : i32
    %c0_i32_0 = arith.constant 0 : i32
    %c0_i32_1 = arith.constant 0 : i32
    return %c0_i32, %c0_i32_0 : i32, i32
  }
  func.func @transform_5(%arg0: i32) -> (i32, i32) {
    %c0_i32 = arith.constant 0 : i32
    %c0_i32_0 = arith.constant 0 : i32
    %c0_i32_1 = arith.constant 0 : i32
    return %c0_i32, %c0_i32_0 : i32, i32
  }
  func.func @transform_6(%arg0: i32) -> (i32, i32, i32) {
    %c0_i32 = arith.constant 0 : i32
    %c0_i32_0 = arith.constant 0 : i32
    %c0_i32_1 = arith.constant 0 : i32
    return %arg0, %c0_i32, %c0_i32_0 : i32, i32, i32
  }
}

</mosaic_0001>

<bundles_post_ra>
// kernel: tpu_custom_call.1
= control target key start
LH: loop header
LB: loop body
LE: loop exit
PB: predicated region body
PF: predicated region fallthrough
CT: control target
= control target key end

     0   :  { %11 = vsyncpa [#allocation4], 0  ;;  %s2397_s0 = inlined_call_operand.hbm [shape: f32[2,8,32], index: 0, kind: input, shape index: {}]   ;;  %s2398_s1 = inlined_call_operand.hbm [shape: f32[32,32], index: 1, kind: input, shape index: {}]   ;;  %s2399_s2 = inlined_call_operand.hbm [shape: f32[32,32], index: 2, kind: input, shape index: {}]   ;;  %s2400_s3 = inlined_call_operand.hbm [shape: f32[32,32], index: 3, kind: input, shape index: {}]   ;;  %s2401_s4 = inlined_call_operand.hbm [shape: f32[32,32], index: 4, kind: input, shape index: {}]   ;;  %s2402_s5 = inlined_call_operand.vmem [shape: f32[1,32], index: 5, kind: input, shape index: {}]   ;;  %s2403_s6 = inlined_call_operand.hbm [shape: f32[2,8,32], index: 6, kind: output, shape index: {}]  }
   0x1   :  { %13 = vsyncpa [#allocation4 + $0x1], 0 }
   0x2   :  { %14 = vsyncpa [#allocation7], 0 }
   0x3   :  { %15 = vsyncpa [#allocation10], 0 }
   0x4   :  { %16 = vsyncpa [#allocation5], 0 }
   0x5   :  { %18 = vsyncpa [#allocation5 + $0x1], 0  ;;  %s2010_s21 = smov 0   ;;  %s2012_s22 = smov 0  }
   0x6   :  { %s2014_s23 = smov 0   ;;  %s2016_s24 = smov 0  }
   0x7 LB: > { %s1958_s25 = smov [#allocation6]   ;;  %s2031_s27 = sadd.s32 4294967295, %s1956_s24   ;;  %s1956_s24 = sphi %s2016_s24, %s2427_s24   ;;  %s1952_s23 = sphi %s2014_s23, %s2426_s23   ;;  %s1948_s22 = sphi %s2012_s22, %s2425_s22   ;;  %s1944_s21 = sphi %s2010_s21, %s2424_s21  }
   0x8   : > { %s198_s26 = sshll.u32 %s1958_s25, 4  ;;  %p1446_p0 = scmp.ge.s32.totalorder %s1956_s24, 1  ;;  %s2036_s26 = int_to_ptr.vmem [resolvable:$true] %s198_s26 }
   0x9   : > { %p2404_p1 = scmp.eq.s32.totalorder %s2031_s27, 0  ;;  %p186_p2 = scmp.lt.s32.totalorder %s1956_s24, 3 }
   0xa   : > { %s1959_s29 = smov [#allocation9]   ;;  %s1960_s8 = smov [#allocation8]  }
   0xb   : > { %p2038_p3 = pnand %p1446_p0, %p186_p2  ;;  %s224_s30 = sshll.u32 %s1959_s29, 4  ;;  %s2051_s30 = int_to_ptr.vmem [resolvable:$true] %s224_s30 }
   0xc   : > { %s211_s9 = sshll.u32 %s1960_s8, 4  ;;  %s1740_s12 = scalar_lea.hbm %s2398_s1, 512  ;;  %s2053_s9 = int_to_ptr.vmem [resolvable:$true] %s211_s9 }
   0xd   : > { %s2407_s28 = scalar_select %p2038_p3, 1, 0 }
   0xe   : > { %p1646_p5 = pneg %p2038_p3  ;;  %p1741_p7 = scmp.ne.s32.totalorder %s2398_s1, %s1740_s12 }
   0xf   : > { %p1747_p11 = scmp.lt.u32.totalorder %s1740_s12, %s2398_s1 }
  0x10   : > { %p2047_p6 = pnand %p1646_p5, %p2404_p1 }
  0x12   : > { %p2063_p8 = pneg %p2047_p6 }
  0x14   : > { %p1743_p9 = pnand %p2063_p8, %p1741_p7 }
  0x16   : > { %p1744_p10 = pneg %p1743_p9 }
  0x18   : > { %p1749_p12 = pnand %p1747_p11, %p1744_p10 }
  0x1a   : > { %1752 = shalt.err (!%p1749_p12)
}
  0x1b   : > { %s1753_s18 = scalar_lea.vmem %s2036_s26, 512  ;;  %p1761_p5 = scmp.lt.s32.totalorder %s2036_s26, %s2036_s26 }
  0x1c   : > { %p1754_p13 = scmp.ne.s32.totalorder %s2036_s26, %s1753_s18  ;;  %p1762_p4 = scmp.lt.s32.totalorder %s1753_s18, %s1753_s18 }
  0x1e   : > { %p1756_p0 = pnand %p1754_p13, %p2063_p8  ;;  %p1763_p7 = por %p1762_p4, %p1761_p5 }
  0x20   : > { %p1757_p2 = pneg %p1756_p0 }
  0x22   : > { %p1764_p9 = pnand %p1763_p7, %p1757_p2 }
  0x24   : > { %1767 = shalt.err (!%p1764_p9)
}
  0x25   : > { %s1961_s19 = smov 128   ;;  %s1962_s20 = smov 8  }
  0x26   : > { %1649 = dma.hbm_to_vmem [thread:$0]  (!%p2047_p6), %s2398_s1, 512, %s2036_s26, [#allocation7], %s1961_s19, %s1961_s19, %s1962_s20  }
  0x27   : > { %s1768_s11 = scalar_lea.hbm %s2400_s3, 512 }
  0x28   : > { %p1769_p4 = scmp.ne.s32.totalorder %s2400_s3, %s1768_s11  ;;  %p1775_p12 = scmp.lt.u32.totalorder %s1768_s11, %s2400_s3 }
  0x2a   : > { %p1771_p10 = pnand %p1769_p4, %p2063_p8 }
  0x2c   : > { %p1772_p11 = pneg %p1771_p10 }
  0x2e   : > { %p1777_p13 = pnand %p1775_p12, %p1772_p11 }
  0x30   : > { %1780 = shalt.err (!%p1777_p13)
}
  0x31   : > { %s1781_s26 = scalar_lea.vmem %s2051_s30, 512  ;;  %p1789_p7 = scmp.lt.s32.totalorder %s2051_s30, %s2051_s30 }
  0x32   : > { %p1782_p0 = scmp.ne.s32.totalorder %s2051_s30, %s1781_s26  ;;  %p1790_p9 = scmp.lt.s32.totalorder %s1781_s26, %s1781_s26 }
  0x34   : > { %p1784_p2 = pnand %p1782_p0, %p2063_p8  ;;  %p1791_p4 = por %p1790_p9, %p1789_p7 }
  0x36   : > { %p1785_p5 = pneg %p1784_p2 }
  0x38   : > { %p1792_p10 = pnand %p1791_p4, %p1785_p5 }
  0x3a   : > { %1795 = shalt.err (!%p1792_p10)
}
  0x3b   : > { %1655 = dma.hbm_to_vmem [thread:$0]  (!%p2047_p6), %s2400_s3, 512, %s2051_s30, [#allocation10], %s1961_s19, %s1961_s19, %s1962_s20  }
  0x3c   : > { %s1796_s8 = scalar_lea.hbm %s2399_s2, 512 }
  0x3d   : > { %p1797_p11 = scmp.ne.s32.totalorder %s2399_s2, %s1796_s8  ;;  %p1803_p0 = scmp.lt.u32.totalorder %s1796_s8, %s2399_s2 }
  0x3f   : > { %p1799_p12 = pnand %p1797_p11, %p2063_p8 }
  0x41   : > { %p1800_p13 = pneg %p1799_p12 }
  0x43   : > { %p1805_p2 = pnand %p1803_p0, %p1800_p13 }
  0x45   : > { %1808 = shalt.err (!%p1805_p2)
}
  0x46   : > { %s1809_s30 = scalar_lea.vmem %s2053_s9, 512  ;;  %p1817_p4 = scmp.lt.s32.totalorder %s2053_s9, %s2053_s9 }
  0x47   : > { %p1810_p5 = scmp.ne.s32.totalorder %s2053_s9, %s1809_s30  ;;  %p1818_p10 = scmp.lt.s32.totalorder %s1809_s30, %s1809_s30 }
  0x49   : > { %p1812_p7 = pnand %p1810_p5, %p2063_p8  ;;  %p1819_p11 = por %p1818_p10, %p1817_p4 }
  0x4b   : > { %p1813_p9 = pneg %p1812_p7 }
  0x4d   : > { %p1820_p12 = pnand %p1819_p11, %p1813_p9 }
  0x4f   : > { %1823 = shalt.err (!%p1820_p12)
}
  0x50   : > { %1652 = dma.hbm_to_vmem [thread:$0]  (!%p2047_p6), %s2399_s2, 512, %s2053_s9, [#allocation7], %s1961_s19, %s1961_s19, %s1962_s20  }
  0x51   : > { %s1963_s26 = smov [#allocation11]   ;;  %s1824_s29 = scalar_lea.hbm %s2401_s4, 512 }
  0x52   : > { %s237_s17 = sshll.u32 %s1963_s26, 4  ;;  %p1825_p13 = scmp.ne.s32.totalorder %s2401_s4, %s1824_s29  ;;  %s238_s17 = int_to_ptr.vmem [resolvable:$true] %s237_s17 }
  0x53   : > { %p1831_p5 = scmp.lt.u32.totalorder %s1824_s29, %s2401_s4 }
  0x54   : > { %p1827_p0 = pnand %p1825_p13, %p2063_p8 }
  0x56   : > { %p1828_p2 = pneg %p1827_p0 }
  0x58   : > { %p1833_p7 = pnand %p1831_p5, %p1828_p2 }
  0x5a   : > { %1836 = shalt.err (!%p1833_p7)
}
  0x5b   : > { %s1837_s9 = scalar_lea.vmem %s238_s17, 512  ;;  %p1845_p11 = scmp.lt.s32.totalorder %s238_s17, %s238_s17 }
  0x5c   : > { %p1838_p9 = scmp.ne.s32.totalorder %s238_s17, %s1837_s9  ;;  %p1846_p12 = scmp.lt.s32.totalorder %s1837_s9, %s1837_s9 }
  0x5e   : > { %p1840_p4 = pnand %p1838_p9, %p2063_p8  ;;  %p1847_p1 = por %p1846_p12, %p1845_p11 }
  0x60   : > { %p1841_p10 = pneg %p1840_p4 }
  0x62   : > { %p1848_p3 = pnand %p1847_p1, %p1841_p10 }
  0x64   : > { %1851 = shalt.err (!%p1848_p3)
}
  0x65   : > { %1658 = dma.hbm_to_vmem [thread:$0]  (!%p2047_p6), %s2401_s4, 512, %s238_s17, [#allocation10], %s1961_s19, %s1961_s19, %s1962_s20  }
  0x66   : > { %s1445_s7 = sadd.s32 4294967294, %s1956_s24   ;;  %s2162_s15 = sadd.s32 1, %s1956_s24  }
  0x67   : > { %s28_s14 = ssub.s32 %s1956_s24, %s2162_s15  ;;  %s31_s16 = sadd.s32 1, %s1952_s23 }
  0x68   : > { %p29_p1 = scmp.eq.s32.totalorder %s28_s14, 0  ;;  %p38_p3 = scmp.ne.s32.totalorder %s1952_s23, %s1948_s22 }
  0x69   : > { %p39_p8 = scmp.eq.s32.totalorder %s1956_s24, 0  ;;  %p44_p13 = scmp.ne.s32.totalorder %s1948_s22, %s1944_s21 }
  0x6a   : > { %s2173_s26 = scalar_select %p29_p1, %s1952_s23, %s31_s16  }
  0x6b   : > { %p2175_p0 = por %p39_p8, %p38_p3  ;;  %p2411_p2 = scmp.eq.s32.totalorder %s2031_s27, 0 }
  0x6c   : > { %p173_p5 = scmp.eq.s32.totalorder %s2031_s27, 1  ;;  %p179_p7 = scmp.eq.s32.totalorder %s1445_s7, 1 }
  0x6d   : > { %p2181_p6 = por %p2411_p2, %p44_p13  ;;  %p1671_p9 = scmp.lt.s32.totalorder %s1956_s24, 2 }
  0x6e   : > { %s254_s20 = sand.u32 1, %s1952_s23   ;;  %p2188_p4 = por %p173_p5, %p38_p3 }
  0x6f   : > { %p2192_p10 = por %p179_p7, %p44_p13  ;;  %s1452_s29 = sshll.u32 %s254_s20, 3 }
  0x70   : > { %s2413_s17 = scalar_select %p2188_p4, 1, 0 }
  0x71   : > { %s2414_s25 = scalar_select %p2192_p10, 1, 0 }
  0x72   : > { %s1453_s8 = sshll.u32 %s1956_s24, 7  ;;  %s258_s9 = scalar_lea.vmem [#allocation3], %s1452_s29 }
  0x73   : > { %s2200_s12 = scalar_lea.hbm %s2397_s0, %s1453_s8  ;;  %s265_s13 = sshll.u32 %s258_s9, 4  ;;  %s2202_s13 = int_to_ptr.vmem [resolvable:$true] %s265_s13 }
  0x74   : > { %p2206_p11 = pnand %p1671_p9, %p2175_p0  ;;  %s255_s7 = scalar_lea.sflag [#allocation4], %s254_s20 }
  0x75   : > { %s1852_s14 = scalar_lea.hbm %s2200_s12, 128  ;;  %s1857_s8 = scalar_lea.hbm %s2397_s0, 256 }
  0x76   : > { %p1853_p12 = scmp.ne.s32.totalorder %s2200_s12, %s1852_s14  ;;  %p1854_p1 = pneg %p2206_p11 }
  0x77   : > { %p1858_p13 = scmp.lt.u32.totalorder %s2200_s12, %s2397_s0  ;;  %p1859_p0 = scmp.lt.u32.totalorder %s1857_s8, %s1852_s14 }
  0x78   : > { %p1855_p3 = pnand %p1854_p1, %p1853_p12  ;;  %p1861_p5 = scmp.lt.u32.totalorder %s1852_s14, %s2200_s12 }
  0x79   : > { %p1860_p2 = por %p1859_p0, %p1858_p13 }
  0x7a   : > { %p1856_p8 = pneg %p1855_p3 }
  0x7b   : > { %p1862_p7 = por %p1861_p5, %p1860_p2 }
  0x7d   : > { %p1863_p9 = pnand %p1862_p7, %p1856_p8 }
  0x7f   : > { %1866 = shalt.err (!%p1863_p9)
}
  0x80   : > { %s1867_s20 = scalar_lea.vmem %s2202_s13, 128  ;;  %s1964_s11 = smov [#allocation3]  }
  0x81   : > { %p1868_p12 = scmp.ne.s32.totalorder %s2202_s13, %s1867_s20  ;;  %s1872_s9 = sshll.u32 %s1964_s11, 4  ;;  %s1873_s9 = int_to_ptr.vmem [resolvable:$false] %s1872_s9 }
  0x82   : > { %s1874_s16 = scalar_lea.vmem %s1873_s9, 256  ;;  %p1875_p4 = scmp.lt.s32.totalorder %s2202_s13, %s1873_s9 }
  0x83   : > { %p1870_p3 = pnand %p1868_p12, %p1854_p1  ;;  %p1876_p13 = scmp.lt.s32.totalorder %s1874_s16, %s1867_s20 }
  0x85   : > { %p1871_p10 = pneg %p1870_p3  ;;  %p1877_p0 = por %p1876_p13, %p1875_p4 }
  0x87   : > { %p1878_p2 = pnand %p1877_p0, %p1871_p10 }
  0x89   : > { %1881 = shalt.err (!%p1878_p2)
}
  0x8a   : > { %1662 = dma.hbm_to_vmem [thread:$0]  (!%p2206_p11), %s2200_s12, 128, %s2202_s13, %s255_s7  }
  0x8b   : > { %p2416_p8 = scmp.ne.s32.totalorder %s2407_s28, 0 }
  0x8c   : > { %s2238_s14 = sand.u32 (!%p2416_p8), 1, %s1948_s22  }
  0x8d   : > { %274 = sbr.rel (%p2416_p8) target bundleno = 2066 (0x812), region = 44  ;;  %s1455_s29 = sshll.u32 (!%p2416_p8), %s2238_s14, 3 }
  0x8e   : > { %s277_s8 = scalar_lea.sflag (!%p2416_p8), [#allocation4], %s2238_s14  ;;  %s2244_s18 = scalar_lea.vmem (!%p2416_p8), [#allocation3], %s1455_s29 }
  0x94   : > { %1927 = dma.done.wait (%p2181_p6), %s277_s8, 128  }
  0x95   : > { %1929 = vsyncadd (%p2181_p6), %s277_s8, 4294967168  ;;  %p2417_p4 = scmp.eq.s32.totalorder %s2031_s27, 0 }
  0x97   : > { %1931 = dma.done.wait (%p2417_p4), [#allocation7], 1024   ;;  %p2418_p10 = pmov %p2417_p4 }
  0x98   : > { %p2419_p11 = pmov %p2417_p4 }
  0x99   : > { %1933 = vsyncadd (%p2418_p10), [#allocation7], 4294966272 }
  0x9a   : > { %1935 = dma.done.wait (%p2419_p11), [#allocation10], 1024   ;;  %p2420_p1 = pmov %p2417_p4 }
  0x9b   : > { %v1965_v0 = vmov 0.0|0.0   ;;  %vm1966_vm0 = vmmov 0   ;;  %v1967_v1 = vmov 0.0   ;;  %v404_v2 = vld [vmem:[#allocation8] sm:$0xff]  ;;  %v405_v3 = vld [vmem:[#allocation8 + $0x8] sm:$0xff]  ;;  %v406_v7 = vld [vmem:[#allocation8 + $0x10] sm:$0xff]  ;;  %v552_v25 = vlaneseq }
  0x9c   : > { %1937 = vsyncadd (%p2420_p1), [#allocation10], 4294966272  ;;  %1608 = vmatprep.subr.bf16.mxu1 %v1965_v0  ;;  %1602 = vmatprep.subr.bf16.mxu0 %v1965_v0  ;;  %v326_v4 = vld [vmem:[#allocation6] sm:$0xff]  ;;  %v1609_v5 = vpack.c.bf16 %v405_v3, %v404_v2  ;;  %v327_v6 = vld [vmem:[#allocation6 + $0x8] sm:$0xff]  ;;  %vm330_vm1 = vcmask 261120   ;;  %vm557_vm2 = vcmask 64512  }
  0x9d   : > { %1537 = vmatprep.mubr.msk.f32.mxu1 %vm1966_vm0, %v1967_v1  ;;  %1526 = vmatprep.mubr.msk.f32.mxu0 %vm1966_vm0, %v1967_v1  ;;  %v407_v8 = vld [vmem:[#allocation8 + $0x18] sm:$0xff]  ;;  %v1603_v9 = vpack.c.bf16 %v327_v6, %v326_v4  ;;  %v328_v10 = vld [vmem:[#allocation6 + $0x10] sm:$0xff]  ;;  %s1968_s28 = smov 120   ;;  %s1969_s19 = smov 112   ;;  %v478_v19 = vld [vmem:[#allocation9] sm:$0xff]  ;;  %v553_v26 = vshrl.u32 %v552_v25, 7 }
  0x9e   : > { %v329_v11 = vld [vmem:[#allocation6 + $0x18] sm:$0xff]  ;;  %1610 = vmatpush3.bf16.msra.mxu1 %v1609_v5  ;;  %v1612_v12 = vpack.c.bf16 %v407_v8, %v406_v7  ;;  %s1970_s12 = smov 104   ;;  %v479_v20 = vld [vmem:[#allocation9 + $0x8] sm:$0xff]  ;;  %v480_v21 = vld [vmem:[#allocation9 + $0x10] sm:$0xff]  ;;  %v555_v27 = vand.u32 127, %v552_v25  ;;  %s1971_s13 = smov 8  }
  0x9f   : > { %1604 = vmatpush3.bf16.msra.mxu0 %v1603_v9  ;;  %1611 = vmatprep.subr.bf16.mxu1 %v1965_v0  ;;  %v1606_v13 = vpack.c.bf16 %v329_v11, %v328_v10  ;;  %v325_v14 = vld [vmem:[%s2244_s18] sm:$0xff]  ;;  %v1615_v22 = vpack.c.bf16 %v479_v20, %v478_v19  ;;  %s1972_s30 = smov 16   ;;  %s1973_s7 = smov 24   ;;  %vm891_vm4 = vcmask 130112   ;;  %vm1063_vm5 = vcmask 195712  }
  0xa0   : > { %1605 = vmatprep.subr.bf16.mxu0 %v1965_v0  ;;  %v481_v23 = vld [vmem:[#allocation9 + $0x18] sm:$0xff]  ;;  %vm556_vm3 = vcmp.ge.s32.totalorder %v553_v26, %v555_v27  ;;  %v1238_v27 = vld [vmem:[#allocation11] sm:$0xff]  ;;  %vm1235_vm6 = vcmask 261312   ;;  %s1479_s11 = sshll.u32 %s2031_s27, 7  ;;  %s324_s9 = scalar_lea.vmem [#allocation12], %s1455_s29 }
  0xa1   : > { %v1618_v24 = vpack.c.bf16 %v481_v23, %v480_v21  ;;  %s1337_s16 = sshll.u32 %s324_s9, 4  ;;  %p2421_p5 = scmp.ne.s32.totalorder %s2413_s17, 0  ;;  %s2354_s16 = int_to_ptr.vmem [resolvable:$true] %s1337_s16 }
  0xa2   : > { %1613 = vmatpush3.bf16.msra.mxu1 %v1612_v12  ;;  %s1882_s27 = scalar_lea.vmem %s2354_s16, 128  ;;  %s1974_s29 = smov [#allocation12]  }
  0xa3   : > { %1607 = vmatpush3.bf16.msra.mxu0 %v1606_v13  ;;  %1551 = vmatprep.subr.mxu1 %v1967_v1  ;;  %p1883_p6 = scmp.ne.s32.totalorder %s2354_s16, %s1882_s27 }
  0xa4   : > { %1614 = vmatprep.subr.bf16.mxu0 %v1965_v0 }
  0xa5   : > { %1538 = vmatmul.mubr.msk.f32.vlgmr.msra.gmra.mrb[0].mxu1 %vm330_vm1, %v325_v14  ;;  %p1884_p7 = pnand %p1883_p6, %p2421_p5 }
  0xa6   : > { %1527 = vmatmul.mubr.msk.f32.vlgmr.msra.gmra.mrb[0].mxu0 %vm330_vm1, %v325_v14  ;;  %1553 = vmatprep.mubr.msk.f32.mxu1 %vm1966_vm0, %v1967_v1 }
  0xa7   : > { %1548 = vmatprep.mubr.msk.f32.mxu0 %vm1966_vm0, %v1967_v1  ;;  %1616 = vmatpush3.bf16.msra.mxu0 %v1615_v22  ;;  %p1885_p9 = pneg %p1884_p7 }
  0xa8   : > { %1617 = vmatprep.subr.bf16.mxu0 %v1965_v0 }
  0xab   : > { %1619 = vmatpush3.bf16.msra.mxu0 %v1618_v24 }
  0xac   : > { %1571 = vmatprep.subr.mxu0 %v1967_v1 }
  0xae   : > { %1549 = vmatmul.mubr.msk.f32.vlgmr.msra.gmra.mrb[2].mxu0 %vm330_vm1, %v325_v14 }
  0xaf   : > { %1573 = vmatprep.mubr.msk.f32.mxu0 %vm1966_vm0, %v1967_v1 }
 0x178   : > { %v474_v15 = vpop.f32.mrb[0].mxu1 }
 0x179   : > { %722 = vrot.lane.b32.xlu1 %v474_v15, %s1968_s28  ;;  %v1539_v16 = vpop.f32.mrb[1].mxu1  ;;  %1552 = vmatpush3.xpose.msk.msra.mxu1 %vm557_vm2, %v474_v15  ;;  %v400_v17 = vpop.f32.mrb[0].mxu0 }
 0x17a   : > { %v1528_v18 = vpop.f32.mrb[1].mxu0  ;;  %1556 = vmatprep.subr.mxu1 %v1967_v1 }
 0x17c   : > { %1554 = vmatmul.mubr.msk.f32.vlgmr.msra.gmra.mrb[2].mxu1 %vm557_vm2, %v400_v17 }
 0x17d   : > { %720 = vrot.lane.b32.xlu1 %v400_v17, %s1968_s28  ;;  %1558 = vmatprep.mubr.msk.f32.mxu1 %vm1966_vm0, %v1967_v1 }
 0x181   : > { %893 = vrot.lane.b32.xlu1 %v400_v17, %s1969_s19  ;;  %v2293_v37 = vpop.f32.mrb[2].mxu0 }
 0x182   : > { %v1550_v38 = vpop.f32.mrb[3].mxu0  ;;  %1557 = vmatpush3.msra.mxu1 %v2293_v37 }
 0x183   : > { %1561 = vmatprep.subr.mxu1 %v1967_v1 }
 0x185   : > { %1067 = vrot.lane.b32.xlu1 %v474_v15, %s1970_s12 }
 0x189   : > { %1065 = vrot.lane.b32.xlu1 %v400_v17, %s1970_s12 }
 0x1eb   : > { %v723_v39 = vpop.permute.xlu1 %722 }
 0x1ef   : > { %v721_v40 = vpop.permute.xlu1 %720 }
 0x1f3   : > { %v894_v41 = vpop.permute.xlu1 %893 }
 0x1f7   : > { %v1068_v44 = vpop.permute.xlu1 %1067 }
 0x1fb   : > { %v1066_v46 = vpop.permute.xlu1 %1065 }
 0x24f   : > { %v630_v28 = vpop.f32.mrb[2].mxu1 }
 0x250   : > { %v634_v29 = vsel %vm556_vm3, %v630_v28, -1e+30  ;;  %v1555_v30 = vpop.f32.mrb[3].mxu1  ;;  %v1239_v28 = vld [vmem:[#allocation11 + $0x8] sm:$0xff] }
 0x251   : > { %v635_v31 = vsel %vm557_vm2, %v634_v29, -inf  ;;  %v1240_v30 = vld [vmem:[#allocation11 + $0x10] sm:$0xff] }
 0x252   : > { %636 = vmax.xlane.f32.xlu0 %v635_v31  ;;  %v1241_v31 = vld [vmem:[#allocation11 + $0x18] sm:$0xff] }
 0x2df   : > { %v637_v32 = vpop.xlane.xlu0 %636 }
 0x2e0   : > { %v638_v33 = vsub.f32 %v634_v29, %v637_v32  ;;  %v1621_v29 = vpack.c.bf16 %v1239_v28, %v1238_v27  ;;  %v1624_v32 = vpack.c.bf16 %v1241_v31, %v1240_v30 }
 0x2e2   : > { %v639_v34 = vmul.f32 1.442695, %v638_v33 }
 0x2e4   : > { %1724 = vpow2.f32 %v639_v34 }
 0x2ee   : > { %v1725_v35 = vpop.eup %1724 }
 0x2ef   : > { %v641_v36 = vsel %vm557_vm2, %v1725_v35, 0.0 }
 0x2f0   : > { %642 = vadd.xlane.f32.xlu0 %v641_v36 }
 0x306   : > { %895 = vrot.lane.b32.xlu0 %v474_v15, %s1969_s19 }
 0x37d   : > { %v643_v42 = vpop.xlane.xlu0 %642 }
 0x37e   : > { %1726 = vrcp.f32 %v643_v42 }
 0x381   : > { %v896_v43 = vpop.permute.xlu0 %895 }
 0x382   : > { %1572 = vmatpush3.xpose.msk.msra.mxu0 %vm557_vm2, %v896_v43 }
 0x383   : > { %1581 = vmatprep.subr.mxu0 %v1967_v1 }
 0x385   : > { %1574 = vmatmul.mubr.msk.f32.vlgmr.msra.gmra.mrb[4].mxu0 %vm557_vm2, %v894_v41  ;;  %v1476_v41 = vld [vmem:[%s2402_s5] ss:$0 sm:$0xff] }
 0x386   : > { %1582 = vmatpush3.xpose.msk.msra.mxu0 %vm557_vm2, %v1068_v44  ;;  %1583 = vmatprep.mubr.msk.f32.mxu0 %vm1966_vm0, %v1967_v1 }
 0x387   : > { %1620 = vmatprep.subr.bf16.mxu0 %v1965_v0 }
 0x388   : > { %v1727_v45 = vpop.eup %1726 }
 0x389   : > { %v645_v47 = vmul.f32 %v1727_v45, %v1725_v35  ;;  %1584 = vmatmul.mubr.msk.f32.vlgmr.msra.gmra.mrb[6].mxu0 %vm557_vm2, %v1066_v46 }
 0x38a   : > { %1599 = vmatprep.mubr.msk.f32.mxu0 %vm1966_vm0, %v1967_v1  ;;  %1622 = vmatpush3.bf16.msra.mxu0 %v1621_v29 }
 0x38b   : > { %1559 = vmatmul.mubr.msk.f32.vlgmr.msra.gmra.mrb[4].mxu1 %vm557_vm2, %v645_v47  ;;  %1623 = vmatprep.subr.bf16.mxu0 %v1965_v0 }
 0x38c   : > { %1562 = vmatpush3.xpose.msk.msra.mxu1 %vm557_vm2, %v723_v39  ;;  %1563 = vmatprep.mubr.msk.f32.mxu1 %vm1966_vm0, %v1967_v1 }
 0x38d   : > { %1566 = vmatprep.subr.mxu1 %v1967_v1 }
 0x38e   : > { %1625 = vmatpush3.bf16.msra.mxu0 %v1624_v32 }
 0x38f   : > { %1564 = vmatmul.mubr.msk.f32.vlgmr.msra.gmra.mrb[6].mxu1 %vm557_vm2, %v721_v40 }
 0x390   : > { %1568 = vmatprep.mubr.msk.f32.mxu1 %vm1966_vm0, %v1967_v1 }
 0x458   : > { %v967_v48 = vpop.f32.mrb[4].mxu0 }
 0x459   : > { %v971_v49 = vsel %vm556_vm3, %v967_v48, -1e+30  ;;  %v1575_v50 = vpop.f32.mrb[5].mxu0 }
 0x45a   : > { %v972_v51 = vsel %vm557_vm2, %v971_v49, -inf }
 0x45b   : > { %973 = vmax.xlane.f32.xlu0 %v972_v51 }
 0x45c   : > { %v1139_v52 = vpop.f32.mrb[6].mxu0 }
 0x45d   : > { %v1585_v53 = vpop.f32.mrb[7].mxu0  ;;  %v1143_v60 = vsel %vm556_vm3, %v1139_v52, -1e+30 }
 0x45e   : > { %v715_v54 = vpop.f32.mrb[4].mxu1  ;;  %v1144_v61 = vsel %vm557_vm2, %v1143_v60, -inf }
 0x45f   : > { %719 = vst.msk [vmem:[#allocation2] sm:$0xff] %vm557_vm2, %v715_v54  ;;  %v1560_v55 = vpop.f32.mrb[5].mxu1 }
 0x462   : > { %v794_v56 = vpop.f32.mrb[6].mxu1 }
 0x463   : > { %v798_v57 = vsel %vm556_vm3, %v794_v56, -1e+30  ;;  %v1565_v58 = vpop.f32.mrb[7].mxu1 }
 0x464   : > { %v799_v59 = vsel %vm557_vm2, %v798_v57, -inf }
 0x465   : > { %800 = vmax.xlane.f32.xlu1 %v799_v59 }
 0x469   : > { %1145 = vmax.xlane.f32.xlu1 %v1144_v61 }
 0x4e8   : > { %v974_v62 = vpop.xlane.xlu0 %973 }
 0x4e9   : > { %v975_v63 = vsub.f32 %v971_v49, %v974_v62 }
 0x4eb   : > { %v976_v2 = vmul.f32 1.442695, %v975_v63 }
 0x4ed   : > { %1728 = vpow2.f32 %v976_v2 }
 0x4f2   : > { %v801_v3 = vpop.xlane.xlu1 %800 }
 0x4f3   : > { %v802_v11 = vsub.f32 %v798_v57, %v801_v3 }
 0x4f5   : > { %v803_v12 = vmul.f32 1.442695, %v802_v11 }
 0x4f6   : > { %v1146_v4 = vpop.xlane.xlu1 %1145 }
 0x4f7   : > { %v1729_v5 = vpop.eup %1728  ;;  %v1147_v6 = vsub.f32 %v1143_v60, %v1146_v4 }
 0x4f8   : > { %v978_v7 = vsel %vm557_vm2, %v1729_v5, 0.0 }
 0x4f9   : > { %v1148_v8 = vmul.f32 1.442695, %v1147_v6  ;;  %979 = vadd.xlane.f32.xlu0 %v978_v7 }
 0x4fb   : > { %1730 = vpow2.f32 %v1148_v8 }
 0x4fc   : > { %1732 = vpow2.f32 %v803_v12 }
 0x505   : > { %v1731_v9 = vpop.eup %1730 }
 0x506   : > { %v1150_v10 = vsel %vm557_vm2, %v1731_v9, 0.0  ;;  %v1733_v13 = vpop.eup %1732 }
 0x507   : > { %1151 = vadd.xlane.f32.xlu1 %v1150_v10  ;;  %v805_v14 = vsel %vm557_vm2, %v1733_v13, 0.0 }
 0x50f   : > { %811 = vrot.lane.b32.xlu0 %v2293_v37, %s1968_s28  ;;  %s2352_s28 = scalar_lea.hbm %s2403_s6, %s1479_s11 }
 0x518   : > { %983 = vrot.lane.b32.xlu1 %v2293_v37, %s1969_s19  ;;  %s1324_s19 = scalar_lea.sflag [#allocation5], %s2238_s14 }
 0x53c   : > { %806 = vadd.xlane.f32.xlu1 %v805_v14 }
 0x54d   : > { %1155 = vrot.lane.b32.xlu1 %v2293_v37, %s1970_s12  ;;  %s1886_s12 = sshll.u32 %s1974_s29, 4  ;;  %s1887_s12 = int_to_ptr.vmem [resolvable:$false] %s1886_s12 }
 0x54e   : > { %p1889_p12 = scmp.lt.s32.totalorder %s2354_s16, %s1887_s12 }
 0x586   : > { %v980_v15 = vpop.xlane.xlu0 %979 }
 0x58a   : > { %v812_v16 = vpop.permute.xlu0 %811 }
 0x58b   : > { %1567 = vmatpush3.msra.mxu1 %v812_v16 }
 0x58c   : > { %1576 = vmatprep.subr.mxu1 %v1967_v1 }
 0x594   : > { %v1152_v17 = vpop.xlane.xlu1 %1151 }
 0x598   : > { %v984_v18 = vpop.permute.xlu1 %983 }
 0x5c9   : > { %v807_v19 = vpop.xlane.xlu1 %806 }
 0x5ca   : > { %1734 = vrcp.f32 %v807_v19 }
 0x5cb   : > { %1736 = vrcp.f32 %v980_v15 }
 0x5cc   : > { %1738 = vrcp.f32 %v1152_v17 }
 0x5cd   : > { %v1156_v25 = vpop.permute.xlu1 %1155 }
 0x5d4   : > { %v1735_v20 = vpop.eup %1734 }
 0x5d5   : > { %v809_v21 = vmul.f32 %v1735_v20, %v1733_v13  ;;  %v1737_v22 = vpop.eup %1736 }
 0x5d6   : > { %v982_v23 = vmul.f32 %v1737_v22, %v1729_v5  ;;  %v1739_v24 = vpop.eup %1738 }
 0x5d7   : > { %1569 = vmatmul.mubr.msk.f32.vlgmr.msra.gmra.mrb[8].mxu1 %vm557_vm2, %v809_v21  ;;  %v1154_v26 = vmul.f32 %v1739_v24, %v1731_v9 }
 0x5d8   : > { %1577 = vmatpush3.msra.mxu1 %v984_v18  ;;  %1578 = vmatprep.mubr.msk.f32.mxu1 %vm1966_vm0, %v1967_v1 }
 0x5d9   : > { %1586 = vmatprep.subr.mxu1 %v1967_v1 }
 0x5db   : > { %1579 = vmatmul.mubr.msk.f32.vlgmr.msra.gmra.mrb[10].mxu1 %vm557_vm2, %v982_v23 }
 0x5dc   : > { %1587 = vmatpush3.msra.mxu1 %v1156_v25  ;;  %1588 = vmatprep.mubr.msk.f32.mxu1 %vm1966_vm0, %v1967_v1 }
 0x5df   : > { %1589 = vmatmul.mubr.msk.f32.vlgmr.msra.gmra.mrb[12].mxu1 %vm557_vm2, %v1154_v26 }
 0x6aa   : > { %v883_v33 = vpop.f32.mrb[8].mxu1 }
 0x6ab   : > { %888 = vrot.lane.b32.xlu0 %v883_v33, %s1971_s13  ;;  %v1570_v34 = vpop.f32.mrb[9].mxu1  ;;  %s1888_s13 = scalar_lea.vmem %s1887_s12, 256 }
 0x6ac   : > { %p1890_p3 = scmp.lt.s32.totalorder %s1888_s13, %s1882_s27 }
 0x6ae   : > { %v1055_v35 = vpop.f32.mrb[10].mxu1  ;;  %p1891_p13 = por %p1890_p3, %p1889_p12 }
 0x6af   : > { %1060 = vrot.lane.b32.xlu1 %v1055_v35, %s1972_s30  ;;  %v1580_v1 = vpop.f32.mrb[11].mxu1 }
 0x6b0   : > { %p1892_p0 = pnand %p1891_p13, %p1885_p9 }
 0x6b2   : > { %v1227_v36 = vpop.f32.mrb[12].mxu1 }
 0x6b3   : > { %1232 = vrot.lane.b32.xlu0 %v1227_v36, %s1973_s7  ;;  %v1590_v37 = vpop.f32.mrb[13].mxu1 }
 0x71d   : > { %v889_v38 = vpop.permute.xlu0 %888 }
 0x71e   : > { %892 = vst.msk [vmem:[#allocation2] sm:$0xff] %vm891_vm4, %v889_v38 }
 0x721   : > { %v1061_v0 = vpop.permute.xlu1 %1060 }
 0x722   : > { %1064 = vst.msk [vmem:[#allocation2] sm:$0xff] %vm1063_vm5, %v1061_v0 }
 0x725   : > { %v1233_v39 = vpop.permute.xlu0 %1232 }
 0x726   : > { %1236 = vst.msk [vmem:[#allocation2] sm:$0xff] %vm1235_vm6, %v1233_v39 }
 0x72d   : > { %v1237_v40 = vld [vmem:[#allocation2] sm:$0xff] }
 0x72e   : > { %1600 = vmatmul.mubr.msk.f32.vlgmr.msra.gmra.mrb[8].mxu0 %vm330_vm1, %v1237_v40 }
 0x801   : > { %v1318_v42 = vpop.f32.mrb[8].mxu0 }
 0x802   : > { %v1319_v43 = vadd.f32 %v1476_v41, %v1318_v42  ;;  %v1601_v44 = vpop.f32.mrb[9].mxu0 }
 0x804   : > { %1322 = vst.msk [vmem:[%s324_s9] sm:$0xff] %vm330_vm1, %v1319_v43 }
 0x805   : > { %1895 = shalt.err (!%p1892_p0)
}
 0x806   : > { %s1896_s14 = scalar_lea.hbm %s2352_s28, 128  ;;  %s1900_s10 = scalar_lea.hbm %s2403_s6, 256 }
 0x807   : > { %p1897_p2 = scmp.ne.s32.totalorder %s2352_s28, %s1896_s14  ;;  %p1901_p10 = scmp.lt.u32.totalorder %s2352_s28, %s2403_s6 }
 0x808   : > { %p1902_p11 = scmp.lt.u32.totalorder %s1900_s10, %s1896_s14  ;;  %p1904_p6 = scmp.lt.u32.totalorder %s1896_s14, %s2352_s28 }
 0x809   : > { %p1898_p8 = pnand %p1897_p2, %p2421_p5 }
 0x80a   : > { %p1903_p1 = por %p1902_p11, %p1901_p10 }
 0x80b   : > { %p1899_p4 = pneg %p1898_p8 }
 0x80c   : > { %p1905_p7 = por %p1904_p6, %p1903_p1 }
 0x80e   : > { %p1906_p9 = pnand %p1905_p7, %p1899_p4 }
 0x810   : > { %1909 = shalt.err (!%p1906_p9)
}
 0x811   : > { %1644 = dma.vmem_to_hbm [thread:$0]  (%p2421_p5), %s2354_s16, 128, %s2352_s28, %s1324_s19  }
 0x812 PF: > { %s1349_s9 = sand.u32 1, %s1944_s21   ;;  %p2422_p12 = scmp.ne.s32.totalorder %s2414_s25, 0 }
 0x813   : > { %p2423_p3 = scmp.ge.s32.totalorder %s1956_s24, 2  ;;  %s1350_s8 = scalar_lea.sflag [#allocation5], %s1349_s9 }
 0x815   : > { %p1664_p13 = pnand %p2423_p3, %p2422_p12 }
 0x817   : > { %1939 = dma.done.wait (!%p1664_p13), %s1350_s8, 128  }
 0x818   : > { %1941 = vsyncadd (!%p1664_p13), %s1350_s8, 4294967168  ;;  %p21_p0 = scmp.ge.s32.totalorder %s2162_s15, 4   ;;  %s2424_s21 = smov %s1948_s22 }
 0x819   : > { %s2425_s22 = smov %s1952_s23  ;;  %s2426_s23 = smov %s2173_s26 }
 0x81a   : > { %s2427_s24 = smov %s2162_s15  ;;  %23 = sbr.rel (!%p21_p0) target bundleno = 7 (0x7), region = 105 }
 0x821   :  { %1355 = vsyncpa [#allocation4], 1 }
 0x822   :  { %1357 = vsyncpa [#allocation4 + $0x1], 1 }
 0x823   :  { %1358 = vsyncpa [#allocation7], 1 }
 0x824   :  { %1359 = vsyncpa [#allocation10], 1 }
 0x825   :  { %1360 = vsyncpa [#allocation5], 1 }
 0x826   :  { %1362 = vsyncpa [#allocation5 + $0x1], 1 }

</bundles_post_ra>
